<compile_context>
chip_gen: v7x
topology: tpu7x:2x2x1
jax: 0.10.0
libtpu: 0.0.40
codegen_flags: <defaults>
</compile_context>

<pallas_src>
import jax
import jax.numpy as jnp
from jax.experimental import pallas as pl
from jax.experimental.pallas import tpu as pltpu


def gcn_classifier_kernel(a_ref, h_ref, p_ref,
                          w1_ref, b1_ref, w2_ref, b2_ref, w3_ref, b3_ref,
                          cw1_ref, cb1_ref, cw2_ref, cb2_ref, cw3_ref, cb3_ref,
                          out_ref):
    # a_ref: (1, NB, NB) bf16 block-diagonal 0/1 adjacency covering GB graphs
    # h_ref: (NB, in_dim) f32 node features for the same GB graphs
    # p_ref: (GB, NB) f32 per-block mean-pool matrix (1/npg on the block diagonal)
    A = a_ref[0]                                   # (NB, NB) bf16 (0/1 -> exact)
    h = h_ref[...]                                 # (NB, in_dim) f32

    # ---- GraphConv 1 ----  in_dim < hidden  =>  (A @ H) @ W1 (exact for norm='none')
    ah = jnp.dot(A, h.astype(jnp.bfloat16), preferred_element_type=jnp.float32)
    h = jnp.dot(ah.astype(jnp.bfloat16), w1_ref[...],
                preferred_element_type=jnp.float32) + b1_ref[...]
    h = jnp.maximum(h, 0.0)                        # f32 epilogue (v5e-friendly)

    # ---- GraphConv 2 ----  A @ (h @ W2)
    hw = jnp.dot(h.astype(jnp.bfloat16), w2_ref[...],
                 preferred_element_type=jnp.float32)
    h = jnp.dot(A, hw.astype(jnp.bfloat16),
                preferred_element_type=jnp.float32) + b2_ref[...]
    h = jnp.maximum(h, 0.0)

    # ---- GraphConv 3 ----
    hw = jnp.dot(h.astype(jnp.bfloat16), w3_ref[...],
                 preferred_element_type=jnp.float32)
    h = jnp.dot(A, hw.astype(jnp.bfloat16),
                preferred_element_type=jnp.float32) + b3_ref[...]
    h = jnp.maximum(h, 0.0)                        # (NB, hidden) f32

    # ---- dgl.mean_nodes: per-graph mean via f32 block-mean matmul ----
    hg = jnp.dot(p_ref[...], h, preferred_element_type=jnp.float32)   # (GB, hidden)

    # ---- classify head: Linear -> ReLU -> Linear -> ReLU -> Linear (M = GB rows) ----
    z = jnp.maximum(jnp.dot(hg.astype(jnp.bfloat16), cw1_ref[...],
                            preferred_element_type=jnp.float32) + cb1_ref[...], 0.0)
    z = jnp.maximum(jnp.dot(z.astype(jnp.bfloat16), cw2_ref[...],
                            preferred_element_type=jnp.float32) + cb2_ref[...], 0.0)
    logits = jnp.dot(z.astype(jnp.bfloat16), cw3_ref[...],
                     preferred_element_type=jnp.float32) + cb3_ref[...]
    out_ref[...] = logits.astype(out_ref.dtype)    # dense (GB, n_classes) store


def classifier_forward(A_packed, H, pool, params):
    """Forward pass of the Classifier on a batched graph.

    A_packed: (num_blocks, NB, NB) bf16 block-diagonal adjacency tiles, each covering
              GB equal-sized graphs (materialized once at graph-construction time).
    H:        (N, in_dim) f32 node features, N = num_blocks * NB.
    pool:     (GB, NB) f32 block-mean matrix (1/npg on the per-graph diagonal blocks).
    params:   (w1,b1,w2,b2,w3,b3,cw1,cb1,cw2,cb2,cw3,cb3), all f32, weights as [in,out].
    """
    (w1, b1, w2, b2, w3, b3, cw1, cb1, cw2, cb2, cw3, cb3) = params
    num_blocks, NB, _ = A_packed.shape
    GB = pool.shape[0]
    in_dim = H.shape[-1]
    hidden = w1.shape[1]
    n_classes = cw3.shape[1]
    G = num_blocks * GB

    # Weights are tiny (<10 KiB total): bf16 MXU operands; biases stay f32.
    w1_bf, w2_bf, w3_bf = (w.astype(jnp.bfloat16) for w in (w1, w2, w3))
    cw1_bf, cw2_bf, cw3_bf = (w.astype(jnp.bfloat16) for w in (cw1, cw2, cw3))

    def const_spec(shape):
        # Full block, constant block index -> DMA'd once, VMEM-resident across steps.
        nd = len(shape)
        return pl.BlockSpec(shape, lambda gb, _nd=nd: (0,) * _nd)

    in_specs = [
        pl.BlockSpec((1, NB, NB), lambda gb: (gb, 0, 0)),    # A: one block-diag tile/step
        pl.BlockSpec((NB, in_dim), lambda gb: (gb, 0)),      # H: NB node rows per step
        const_spec(pool.shape),
        const_spec(w1.shape), const_spec(b1.shape),
        const_spec(w2.shape), const_spec(b2.shape),
        const_spec(w3.shape), const_spec(b3.shape),
        const_spec(cw1.shape), const_spec(cb1.shape),
        const_spec(cw2.shape), const_spec(cb2.shape),
        const_spec(cw3.shape), const_spec(cb3.shape),
    ]

    # Advisory cost hint for XLA scheduling (actual dense-tile FLOPs).
    flops = num_blocks * (
        2 * NB * NB * (in_dim + 2 * hidden)            # three A-aggregation matmuls
        + 2 * NB * hidden * (in_dim + 2 * hidden)      # three weight matmuls
        + 2 * GB * NB * hidden                         # mean-pool matmul
        + 2 * GB * hidden * (2 * hidden + n_classes))  # 3-layer MLP head
    bytes_accessed = (A_packed.size * 2 + H.size * 4 + pool.size * 4
                      + sum(w.size for w in (w1, w2, w3, cw1, cw2, cw3)) * 2
                      + sum(b.size for b in (b1, b2, b3, cb1, cb2, cb3)) * 4
                      + G * n_classes * 4)
    cost = pl.CostEstimate(flops=flops, transcendentals=0,
                           bytes_accessed=bytes_accessed)

    return pl.pallas_call(
        gcn_classifier_kernel,
        out_shape=jax.ShapeDtypeStruct((G, n_classes), jnp.float32),
        grid=(num_blocks,),
        in_specs=in_specs,
        out_specs=pl.BlockSpec((GB, n_classes), lambda gb: (gb, 0)),
        compiler_params=pltpu.CompilerParams(
            # Graph-blocks are independent -> shard across v7x's 2 TCs.
            dimension_semantics=("parallel",)),
        cost_estimate=cost,
    )(A_packed, H, pool, w1_bf, b1, w2_bf, b2, w3_bf, b3,
      cw1_bf, cb1, cw2_bf, cb2, cw3_bf, cb3)


def reference_forward(A_full, H_full, P, params):
    """Pure-f32 reference on the dense batched graph (original module semantics)."""
    (w1, b1, w2, b2, w3, b3, cw1, cb1, cw2, cb2, cw3, cb3) = params
    h = jnp.maximum(A_full @ (H_full @ w1) + b1, 0.0)
    h = jnp.maximum(A_full @ (h @ w2) + b2, 0.0)
    h = jnp.maximum(A_full @ (h @ w3) + b3, 0.0)
    hg = P @ h
    z = jnp.maximum(hg @ cw1 + cb1, 0.0)
    z = jnp.maximum(z @ cw2 + cb2, 0.0)
    return z @ cw3 + cb3


if __name__ == "__main__":
    # Small synthetic batched graph: G graphs, npg nodes each.
    G = 16            # graphs in the batch
    npg = 16          # nodes per graph (equal-sized; see TODO for ragged)
    GB = 8            # graphs per grid step -> node block NB = 128 (native MXU granule
                      # on v5e; pick GB=16 -> NB=256 on v6e/v7x for full MXU K)
    assert G % GB == 0 and (G // GB) >= 2    # >=2 even steps so both v7x TCs get work
    NB = GB * npg
    N = G * npg
    in_dim = 16
    hidden_dim = 32
    n_classes = 8

    key = jax.random.PRNGKey(0)
    keys = jax.random.split(key, 16)

    # Node features and per-graph adjacency (A[dst, src] = 1.0 for edge src->dst).
    H = jax.random.normal(keys[0], (N, in_dim), dtype=jnp.float32)
    A_b = jax.random.bernoulli(keys[1], p=0.3, shape=(G, npg, npg)).astype(jnp.float32)

    def init_w(k, fan_in, fan_out):
        scale = 1.0 / jnp.sqrt(jnp.float32(fan_in))
        return jax.random.uniform(k, (fan_in, fan_out), jnp.float32, -scale, scale)

    # GraphConv weights (stored as [in, out]) and biases (as [1, out]).
    w1 = init_w(keys[2], in_dim, hidden_dim);      b1 = init_w(keys[3], 1, hidden_dim)
    w2 = init_w(keys[4], hidden_dim, hidden_dim);  b2 = init_w(keys[5], 1, hidden_dim)
    w3 = init_w(keys[6], hidden_dim, hidden_dim);  b3 = init_w(keys[7], 1, hidden_dim)
    # Classifier MLP weights (stored as [in, out] = PyTorch Linear weight transposed).
    cw1 = init_w(keys[8], hidden_dim, hidden_dim); cb1 = init_w(keys[9], 1, hidden_dim)
    cw2 = init_w(keys[10], hidden_dim, hidden_dim); cb2 = init_w(keys[11], 1, hidden_dim)
    cw3 = init_w(keys[12], hidden_dim, n_classes); cb3 = init_w(keys[13], 1, n_classes)
    params = (w1, b1, w2, b2, w3, b3, cw1, cb1, cw2, cb2, cw3, cb3)

    # --- One-time "graph construction": pack per-graph adjacencies into block-diagonal
    #     dense bf16 tiles of GB graphs each (0/1 values -> bf16 exact), and build the
    #     per-block mean-pool matrix (identical for every block: equal-sized graphs).
    num_blocks = G // GB
    A_packed = jnp.zeros((num_blocks, NB, NB), jnp.float32)
    for blk in range(num_blocks):
        for j in range(GB):
            g = blk * GB + j
            s = j * npg
            A_packed = A_packed.at[blk, s:s + npg, s:s + npg].set(A_b[g])
    A_packed = A_packed.astype(jnp.bfloat16)

    pool = jnp.zeros((GB, NB), jnp.float32)
    for j in range(GB):
        pool = pool.at[j, j * npg:(j + 1) * npg].set(1.0 / npg)

    out = classifier_forward(A_packed, H, pool, params)
    out = jax.block_until_ready(out)

    # --- Pure-f32 dense batched-graph reference (original module formulation). ---
    A_full = jnp.zeros((N, N), jnp.float32)
    P_full = jnp.zeros((G, N), jnp.float32)
    for g in range(G):
        s = g * npg
        A_full = A_full.at[s:s + npg, s:s + npg].set(A_b[g])
        P_full = P_full.at[g, s:s + npg].set(1.0 / npg)
    ref = reference_forward(A_full, H, P_full, params)

    assert out.shape == (G, n_classes)
    # bf16 MXU operands (f32 accumulation, f32 inter-layer activations) vs f32 ref.
    assert jnp.allclose(out, ref, atol=1e-1, rtol=5e-2), (
        f"max abs err {jnp.max(jnp.abs(out - ref))}")

    print("KERNEL_OK")
</pallas_src>

<mosaic_0001>
module attributes {stable_mosaic.version = 11 : i64} {
  func.func @gcn_classifier_kernel(%arg0: i32, %arg1: memref<1x128x128xbf16, #tpu.memory_space<vmem>>, %arg2: memref<128x16xf32, #tpu.memory_space<vmem>>, %arg3: memref<8x128xf32, #tpu.memory_space<vmem>>, %arg4: memref<16x32xbf16, #tpu.memory_space<vmem>>, %arg5: memref<1x32xf32, #tpu.memory_space<vmem>>, %arg6: memref<32x32xbf16, #tpu.memory_space<vmem>>, %arg7: memref<1x32xf32, #tpu.memory_space<vmem>>, %arg8: memref<32x32xbf16, #tpu.memory_space<vmem>>, %arg9: memref<1x32xf32, #tpu.memory_space<vmem>>, %arg10: memref<32x32xbf16, #tpu.memory_space<vmem>>, %arg11: memref<1x32xf32, #tpu.memory_space<vmem>>, %arg12: memref<32x32xbf16, #tpu.memory_space<vmem>>, %arg13: memref<1x32xf32, #tpu.memory_space<vmem>>, %arg14: memref<32x8xbf16, #tpu.memory_space<vmem>>, %arg15: memref<1x8xf32, #tpu.memory_space<vmem>>, %arg16: memref<8x8xf32, #tpu.memory_space<vmem>>) attributes {dimension_semantics = [#tpu.dimension_semantics<parallel>], iteration_bounds = array<i64: 2>, scalar_prefetch = 0 : i64, scratch_operands = 0 : i64, tpu.core_type = #tpu.core_type<tc>, window_params = [{transform_indices = @transform_0, window_bounds = array<i64: 1, 128, 128>}, {transform_indices = @transform_1, window_bounds = array<i64: 128, 16>}, {pipeline_mode = #tpu.pipeline_mode<synchronous>, transform_indices = @transform_2, window_bounds = array<i64: 8, 128>}, {pipeline_mode = #tpu.pipeline_mode<synchronous>, transform_indices = @transform_3, window_bounds = array<i64: 16, 32>}, {pipeline_mode = #tpu.pipeline_mode<synchronous>, transform_indices = @transform_4, window_bounds = array<i64: 1, 32>}, {pipeline_mode = #tpu.pipeline_mode<synchronous>, transform_indices = @transform_5, window_bounds = array<i64: 32, 32>}, {pipeline_mode = #tpu.pipeline_mode<synchronous>, transform_indices = @transform_6, window_bounds = array<i64: 1, 32>}, {pipeline_mode = #tpu.pipeline_mode<synchronous>, transform_indices = @transform_7, window_bounds = array<i64: 32, 32>}, {pipeline_mode = #tpu.pipeline_mode<synchronous>, transform_indices = @transform_8, window_bounds = array<i64: 1, 32>}, {pipeline_mode = #tpu.pipeline_mode<synchronous>, transform_indices = @transform_9, window_bounds = array<i64: 32, 32>}, {pipeline_mode = #tpu.pipeline_mode<synchronous>, transform_indices = @transform_10, window_bounds = array<i64: 1, 32>}, {pipeline_mode = #tpu.pipeline_mode<synchronous>, transform_indices = @transform_11, window_bounds = array<i64: 32, 32>}, {pipeline_mode = #tpu.pipeline_mode<synchronous>, transform_indices = @transform_12, window_bounds = array<i64: 1, 32>}, {pipeline_mode = #tpu.pipeline_mode<synchronous>, transform_indices = @transform_13, window_bounds = array<i64: 32, 8>}, {pipeline_mode = #tpu.pipeline_mode<synchronous>, transform_indices = @transform_14, window_bounds = array<i64: 1, 8>}, {transform_indices = @transform_15, window_bounds = array<i64: 8, 8>}]} {
    %c0 = arith.constant 0 : index
    %c0_0 = arith.constant 0 : index
    %c0_1 = arith.constant 0 : index
    %0 = vector.load %arg1[%c0, %c0_0, %c0_1] : memref<1x128x128xbf16, #tpu.memory_space<vmem>>, vector<1x128x128xbf16>
    %1 = vector.shape_cast %0 : vector<1x128x128xbf16> to vector<128x128xbf16>
    %c0_2 = arith.constant 0 : index
    %c0_3 = arith.constant 0 : index
    %2 = vector.load %arg2[%c0_2, %c0_3] : memref<128x16xf32, #tpu.memory_space<vmem>>, vector<128x16xf32>
    %3 = arith.truncf %2 : vector<128x16xf32> to vector<128x16xbf16>
    %cst = arith.constant dense<0.000000e+00> : vector<128x16xf32>
    %4 = tpu.matmul %1, %3, %cst {dimension_numbers = #tpu.dot_dimension_numbers<[1], [0], [0], [1], [0, 0, 1, 1], [], []>} : vector<128x128xbf16>, vector<128x16xbf16>, vector<128x16xf32> -> vector<128x16xf32>
    %5 = arith.truncf %4 : vector<128x16xf32> to vector<128x16xbf16>
    %c0_4 = arith.constant 0 : index
    %c0_5 = arith.constant 0 : index
    %6 = vector.load %arg4[%c0_4, %c0_5] : memref<16x32xbf16, #tpu.memory_space<vmem>>, vector<16x32xbf16>
    %cst_6 = arith.constant dense<0.000000e+00> : vector<128x32xf32>
    %7 = tpu.matmul %5, %6, %cst_6 {dimension_numbers = #tpu.dot_dimension_numbers<[1], [0], [0], [1], [0, 0, 1, 1], [], []>} : vector<128x16xbf16>, vector<16x32xbf16>, vector<128x32xf32> -> vector<128x32xf32>
    %c0_7 = arith.constant 0 : index
    %c0_8 = arith.constant 0 : index
    %8 = vector.load %arg5[%c0_7, %c0_8] : memref<1x32xf32, #tpu.memory_space<vmem>>, vector<1x32xf32>
    %9 = vector.broadcast %8 : vector<1x32xf32> to vector<128x32xf32>
    %10 = arith.addf %7, %9 : vector<128x32xf32>
    %cst_9 = arith.constant 0.000000e+00 : f32
    %11 = vector.broadcast %cst_9 : f32 to vector<128x32xf32>
    %12 = arith.maximumf %10, %11 : vector<128x32xf32>
    %13 = arith.truncf %12 : vector<128x32xf32> to vector<128x32xbf16>
    %c0_10 = arith.constant 0 : index
    %c0_11 = arith.constant 0 : index
    %14 = vector.load %arg6[%c0_10, %c0_11] : memref<32x32xbf16, #tpu.memory_space<vmem>>, vector<32x32xbf16>
    %cst_12 = arith.constant dense<0.000000e+00> : vector<128x32xf32>
    %15 = tpu.matmul %13, %14, %cst_12 {dimension_numbers = #tpu.dot_dimension_numbers<[1], [0], [0], [1], [0, 0, 1, 1], [], []>} : vector<128x32xbf16>, vector<32x32xbf16>, vector<128x32xf32> -> vector<128x32xf32>
    %16 = arith.truncf %15 : vector<128x32xf32> to vector<128x32xbf16>
    %cst_13 = arith.constant dense<0.000000e+00> : vector<128x32xf32>
    %17 = tpu.matmul %1, %16, %cst_13 {dimension_numbers = #tpu.dot_dimension_numbers<[1], [0], [0], [1], [0, 0, 1, 1], [], []>} : vector<128x128xbf16>, vector<128x32xbf16>, vector<128x32xf32> -> vector<128x32xf32>
    %c0_14 = arith.constant 0 : index
    %c0_15 = arith.constant 0 : index
    %18 = vector.load %arg7[%c0_14, %c0_15] : memref<1x32xf32, #tpu.memory_space<vmem>>, vector<1x32xf32>
    %19 = vector.broadcast %18 : vector<1x32xf32> to vector<128x32xf32>
    %20 = arith.addf %17, %19 : vector<128x32xf32>
    %cst_16 = arith.constant 0.000000e+00 : f32
    %21 = vector.broadcast %cst_16 : f32 to vector<128x32xf32>
    %22 = arith.maximumf %20, %21 : vector<128x32xf32>
    %23 = arith.truncf %22 : vector<128x32xf32> to vector<128x32xbf16>
    %c0_17 = arith.constant 0 : index
    %c0_18 = arith.constant 0 : index
    %24 = vector.load %arg8[%c0_17, %c0_18] : memref<32x32xbf16, #tpu.memory_space<vmem>>, vector<32x32xbf16>
    %cst_19 = arith.constant dense<0.000000e+00> : vector<128x32xf32>
    %25 = tpu.matmul %23, %24, %cst_19 {dimension_numbers = #tpu.dot_dimension_numbers<[1], [0], [0], [1], [0, 0, 1, 1], [], []>} : vector<128x32xbf16>, vector<32x32xbf16>, vector<128x32xf32> -> vector<128x32xf32>
    %26 = arith.truncf %25 : vector<128x32xf32> to vector<128x32xbf16>
    %cst_20 = arith.constant dense<0.000000e+00> : vector<128x32xf32>
    %27 = tpu.matmul %1, %26, %cst_20 {dimension_numbers = #tpu.dot_dimension_numbers<[1], [0], [0], [1], [0, 0, 1, 1], [], []>} : vector<128x128xbf16>, vector<128x32xbf16>, vector<128x32xf32> -> vector<128x32xf32>
    %c0_21 = arith.constant 0 : index
    %c0_22 = arith.constant 0 : index
    %28 = vector.load %arg9[%c0_21, %c0_22] : memref<1x32xf32, #tpu.memory_space<vmem>>, vector<1x32xf32>
    %29 = vector.broadcast %28 : vector<1x32xf32> to vector<128x32xf32>
    %30 = arith.addf %27, %29 : vector<128x32xf32>
    %cst_23 = arith.constant 0.000000e+00 : f32
    %31 = vector.broadcast %cst_23 : f32 to vector<128x32xf32>
    %32 = arith.maximumf %30, %31 : vector<128x32xf32>
    %c0_24 = arith.constant 0 : index
    %c0_25 = arith.constant 0 : index
    %33 = vector.load %arg3[%c0_24, %c0_25] : memref<8x128xf32, #tpu.memory_space<vmem>>, vector<8x128xf32>
    %cst_26 = arith.constant dense<0.000000e+00> : vector<8x32xf32>
    %34 = tpu.matmul %33, %32, %cst_26 {dimension_numbers = #tpu.dot_dimension_numbers<[1], [0], [0], [1], [0, 0, 1, 1], [], []>} : vector<8x128xf32>, vector<128x32xf32>, vector<8x32xf32> -> vector<8x32xf32>
    %35 = arith.truncf %34 : vector<8x32xf32> to vector<8x32xbf16>
    %c0_27 = arith.constant 0 : index
    %c0_28 = arith.constant 0 : index
    %36 = vector.load %arg10[%c0_27, %c0_28] : memref<32x32xbf16, #tpu.memory_space<vmem>>, vector<32x32xbf16>
    %cst_29 = arith.constant dense<0.000000e+00> : vector<8x32xf32>
    %37 = tpu.matmul %35, %36, %cst_29 {dimension_numbers = #tpu.dot_dimension_numbers<[1], [0], [0], [1], [0, 0, 1, 1], [], []>} : vector<8x32xbf16>, vector<32x32xbf16>, vector<8x32xf32> -> vector<8x32xf32>
    %c0_30 = arith.constant 0 : index
    %c0_31 = arith.constant 0 : index
    %38 = vector.load %arg11[%c0_30, %c0_31] : memref<1x32xf32, #tpu.memory_space<vmem>>, vector<1x32xf32>
    %39 = vector.broadcast %38 : vector<1x32xf32> to vector<8x32xf32>
    %40 = arith.addf %37, %39 : vector<8x32xf32>
    %cst_32 = arith.constant 0.000000e+00 : f32
    %41 = vector.broadcast %cst_32 : f32 to vector<8x32xf32>
    %42 = arith.maximumf %40, %41 : vector<8x32xf32>
    %43 = arith.truncf %42 : vector<8x32xf32> to vector<8x32xbf16>
    %c0_33 = arith.constant 0 : index
    %c0_34 = arith.constant 0 : index
    %44 = vector.load %arg12[%c0_33, %c0_34] : memref<32x32xbf16, #tpu.memory_space<vmem>>, vector<32x32xbf16>
    %cst_35 = arith.constant dense<0.000000e+00> : vector<8x32xf32>
    %45 = tpu.matmul %43, %44, %cst_35 {dimension_numbers = #tpu.dot_dimension_numbers<[1], [0], [0], [1], [0, 0, 1, 1], [], []>} : vector<8x32xbf16>, vector<32x32xbf16>, vector<8x32xf32> -> vector<8x32xf32>
    %c0_36 = arith.constant 0 : index
    %c0_37 = arith.constant 0 : index
    %46 = vector.load %arg13[%c0_36, %c0_37] : memref<1x32xf32, #tpu.memory_space<vmem>>, vector<1x32xf32>
    %47 = vector.broadcast %46 : vector<1x32xf32> to vector<8x32xf32>
    %48 = arith.addf %45, %47 : vector<8x32xf32>
    %cst_38 = arith.constant 0.000000e+00 : f32
    %49 = vector.broadcast %cst_38 : f32 to vector<8x32xf32>
    %50 = arith.maximumf %48, %49 : vector<8x32xf32>
    %51 = arith.truncf %50 : vector<8x32xf32> to vector<8x32xbf16>
    %c0_39 = arith.constant 0 : index
    %c0_40 = arith.constant 0 : index
    %52 = vector.load %arg14[%c0_39, %c0_40] : memref<32x8xbf16, #tpu.memory_space<vmem>>, vector<32x8xbf16>
    %cst_41 = arith.constant dense<0.000000e+00> : vector<8x8xf32>
    %53 = tpu.matmul %51, %52, %cst_41 {dimension_numbers = #tpu.dot_dimension_numbers<[1], [0], [0], [1], [0, 0, 1, 1], [], []>} : vector<8x32xbf16>, vector<32x8xbf16>, vector<8x8xf32> -> vector<8x8xf32>
    %c0_42 = arith.constant 0 : index
    %c0_43 = arith.constant 0 : index
    %54 = vector.load %arg15[%c0_42, %c0_43] : memref<1x8xf32, #tpu.memory_space<vmem>>, vector<1x8xf32>
    %55 = vector.broadcast %54 : vector<1x8xf32> to vector<8x8xf32>
    %56 = arith.addf %53, %55 : vector<8x8xf32>
    %c0_44 = arith.constant 0 : index
    %c0_45 = arith.constant 0 : index
    %57 = vector.load %arg16[%c0_44, %c0_45] : memref<8x8xf32, #tpu.memory_space<vmem>>, vector<8x8xf32>
    tpu.vector_store %arg16[%c0_44, %c0_45], %56 {strides = array<i32>} : memref<8x8xf32, #tpu.memory_space<vmem>>, vector<8x8xf32>,
    return
  }
  func.func @transform_0(%arg0: i32) -> (i32, i32, i32) {
    %c0_i32 = arith.constant 0 : i32
    %c0_i32_0 = arith.constant 0 : i32
    %c0_i32_1 = arith.constant 0 : i32
    return %arg0, %c0_i32, %c0_i32_0 : i32, i32, i32
  }
  func.func @transform_1(%arg0: i32) -> (i32, i32) {
    %c0_i32 = arith.constant 0 : i32
    %c0_i32_0 = arith.constant 0 : i32
    return %arg0, %c0_i32 : i32, i32
  }
  func.func @transform_2(%arg0: i32) -> (i32, i32) {
    %c0_i32 = arith.constant 0 : i32
    %c0_i32_0 = arith.constant 0 : i32
    %c0_i32_1 = arith.constant 0 : i32
    return %c0_i32, %c0_i32_0 : i32, i32
  }
  func.func @transform_3(%arg0: i32) -> (i32, i32) {
    %c0_i32 = arith.constant 0 : i32
    %c0_i32_0 = arith.constant 0 : i32
    %c0_i32_1 = arith.constant 0 : i32
    return %c0_i32, %c0_i32_0 : i32, i32
  }
  func.func @transform_4(%arg0: i32) -> (i32, i32) {
    %c0_i32 = arith.constant 0 : i32
    %c0_i32_0 = arith.constant 0 : i32
    %c0_i32_1 = arith.constant 0 : i32
    return %c0_i32, %c0_i32_0 : i32, i32
  }
  func.func @transform_5(%arg0: i32) -> (i32, i32) {
    %c0_i32 = arith.constant 0 : i32
    %c0_i32_0 = arith.constant 0 : i32
    %c0_i32_1 = arith.constant 0 : i32
    return %c0_i32, %c0_i32_0 : i32, i32
  }
  func.func @transform_6(%arg0: i32) -> (i32, i32) {
    %c0_i32 = arith.constant 0 : i32
    %c0_i32_0 = arith.constant 0 : i32
    %c0_i32_1 = arith.constant 0 : i32
    return %c0_i32, %c0_i32_0 : i32, i32
  }
  func.func @transform_7(%arg0: i32) -> (i32, i32) {
    %c0_i32 = arith.constant 0 : i32
    %c0_i32_0 = arith.constant 0 : i32
    %c0_i32_1 = arith.constant 0 : i32
    return %c0_i32, %c0_i32_0 : i32, i32
  }
  func.func @transform_8(%arg0: i32) -> (i32, i32) {
    %c0_i32 = arith.constant 0 : i32
    %c0_i32_0 = arith.constant 0 : i32
    %c0_i32_1 = arith.constant 0 : i32
    return %c0_i32, %c0_i32_0 : i32, i32
  }
  func.func @transform_9(%arg0: i32) -> (i32, i32) {
    %c0_i32 = arith.constant 0 : i32
    %c0_i32_0 = arith.constant 0 : i32
    %c0_i32_1 = arith.constant 0 : i32
    return %c0_i32, %c0_i32_0 : i32, i32
  }
  func.func @transform_10(%arg0: i32) -> (i32, i32) {
    %c0_i32 = arith.constant 0 : i32
    %c0_i32_0 = arith.constant 0 : i32
    %c0_i32_1 = arith.constant 0 : i32
    return %c0_i32, %c0_i32_0 : i32, i32
  }
  func.func @transform_11(%arg0: i32) -> (i32, i32) {
    %c0_i32 = arith.constant 0 : i32
    %c0_i32_0 = arith.constant 0 : i32
    %c0_i32_1 = arith.constant 0 : i32
    return %c0_i32, %c0_i32_0 : i32, i32
  }
  func.func @transform_12(%arg0: i32) -> (i32, i32) {
    %c0_i32 = arith.constant 0 : i32
    %c0_i32_0 = arith.constant 0 : i32
    %c0_i32_1 = arith.constant 0 : i32
    return %c0_i32, %c0_i32_0 : i32, i32
  }
  func.func @transform_13(%arg0: i32) -> (i32, i32) {
    %c0_i32 = arith.constant 0 : i32
    %c0_i32_0 = arith.constant 0 : i32
    %c0_i32_1 = arith.constant 0 : i32
    return %c0_i32, %c0_i32_0 : i32, i32
  }
  func.func @transform_14(%arg0: i32) -> (i32, i32) {
    %c0_i32 = arith.constant 0 : i32
    %c0_i32_0 = arith.constant 0 : i32
    %c0_i32_1 = arith.constant 0 : i32
    return %c0_i32, %c0_i32_0 : i32, i32
  }
  func.func @transform_15(%arg0: i32) -> (i32, i32) {
    %c0_i32 = arith.constant 0 : i32
    %c0_i32_0 = arith.constant 0 : i32
    return %arg0, %c0_i32 : i32, i32
  }
}

</mosaic_0001>

<bundles_post_ra>
// kernel: tpu_custom_call.1
= control target key start
LH: loop header
LB: loop body
LE: loop exit
PB: predicated region body
PF: predicated region fallthrough
CT: control target
= control target key end

     0   :  { %s2276_s18 = smov 0   ;;  %s2471_s0 = inlined_call_operand.vmem [shape: bf16[2,128,128], index: 0, kind: input, shape index: {}]   ;;  %s2472_s1 = inlined_call_operand.vmem [shape: f32[256,16], index: 1, kind: input, shape index: {}]   ;;  %s2473_s2 = inlined_call_operand.vmem [shape: f32[8,128], index: 2, kind: input, shape index: {}]   ;;  %s2474_s3 = inlined_call_operand.vmem [shape: bf16[16,32], index: 3, kind: input, shape index: {}]   ;;  %s2475_s4 = inlined_call_operand.vmem [shape: f32[1,32], index: 4, kind: input, shape index: {}]   ;;  %s2476_s5 = inlined_call_operand.vmem [shape: bf16[32,32], index: 5, kind: input, shape index: {}]   ;;  %s2477_s6 = inlined_call_operand.vmem [shape: f32[1,32], index: 6, kind: input, shape index: {}]   ;;  %s2478_s7 = inlined_call_operand.vmem [shape: bf16[32,32], index: 7, kind: input, shape index: {}]   ;;  %s2479_s8 = inlined_call_operand.vmem [shape: f32[1,32], index: 8, kind: input, shape index: {}]   ;;  %s2480_s9 = inlined_call_operand.vmem [shape: bf16[32,32], index: 9, kind: input, shape index: {}]   ;;  %s2481_s10 = inlined_call_operand.vmem [shape: f32[1,32], index: 10, kind: input, shape index: {}]   ;;  %s2482_s11 = inlined_call_operand.vmem [shape: bf16[32,32], index: 11, kind: input, shape index: {}]   ;;  %s2483_s12 = inlined_call_operand.vmem [shape: f32[1,32], index: 12, kind: input, shape index: {}]   ;;  %s2484_s13 = inlined_call_operand.vmem [shape: bf16[32,8], index: 13, kind: input, shape index: {}]   ;;  %s2485_s14 = inlined_call_operand.vmem [shape: f32[1,8], index: 14, kind: input, shape index: {}]   ;;  %s2486_s15 = inlined_call_operand.vmem [shape: f32[16,8], index: 15, kind: output, shape index: {}]  }
   0x1 LB: > { %s1750_s19 = sadd.s32 4294967295, %s2191_s18   ;;  %p1754_p0 = scmp.ge.s32.totalorder %s2191_s18, 1  ;;  %s2191_s18 = sphi %s2276_s18, %s25_s18  }
   0x2   : > { %p448_p1 = scmp.lt.s32.totalorder %s2191_s18, 3 }
   0x4   : > { %p449_p2 = pnand %p1754_p0, %p448_p1 }
   0x5   : > { %s1757_s20 = sshll.u32 (!%p449_p2), %s1750_s19, 4  ;;  %p500_p3 = scmp.lt.s32.totalorder (!%p449_p2), %s1750_s19, 1  ;;  %v2174_v32 = vld [vmem:[%s2474_s3] sm:$0xff] (!%p449_p2)   ;;  %vm724_vm0 = vcmask (!%p449_p2), 130048   ;;  %v2176_v40 = vld [vmem:[%s2476_s5 + $0x8] sm:$0xff] (!%p449_p2)   ;;  %vm886_vm1 = vcmask (!%p449_p2), 261120  }
   0x6   : > { %452 = sbr.rel (%p449_p2) target bundleno = 2329 (0x919), region = 80  ;;  %p506_p4 = scmp.lt.s32.totalorder (!%p449_p2), %s1757_s20, 31  ;;  %1950 = vmatprep.subr.bf16.mxu1 (!%p449_p2), %v2174_v32  ;;  %v2175_v33 = vld [vmem:[%s2476_s5] sm:$0xff] (!%p449_p2)   ;;  %vm2194_vm2 = vmmov (!%p449_p2), 0   ;;  %vm1683_vm3 = vcmask (!%p449_p2), 64512  }
   0x7   : > { %1951 = vmatpush3.bf16.msra.mxu1 (!%p449_p2), %v2174_v32  ;;  %v1768_v59 = vld [vmem:[%s2475_s4] ss:$0 sm:$0xff] (!%p449_p2) }
   0x8   : > { %1968 = vmatprep.subr.bf16.mxu1 (!%p449_p2), %v2175_v33 }
   0xd   : > { %s2488_s19 = smov (!%p500_p3, %s1750_s19), 1  ;;  %s2490_s20 = smov (!%p506_p4, %s1757_s20), 31 }
   0xe   : > { %s1814_s21 = sshll.u32 %s2488_s19, 6  ;;  %s1758_s22 = sshll.u32 %s2490_s20, 3 }
   0xf   : > { %s2290_s25 = scalar_lea.vmem %s2471_s0, %s1814_s21  ;;  %s2295_s28 = scalar_lea.vmem %s2472_s1, %s1758_s22 }
  0x10   : > { %v2298_v0 = vld [vmem:[%s2290_s25] sm:$0xff]   ;;  %v533_v2 = vld [vmem:[%s2295_s28 + $0x8] sm:$0xff]  ;;  %v534_v3 = vld [vmem:[%s2295_s28 + $0x10] sm:$0xff]  ;;  %s1759_s24 = sshll.u32 %s2488_s19, 3 }
  0x11   : > { %v532_v1 = vld [vmem:[%s2295_s28] sm:$0xff]  ;;  %v535_v5 = vld [vmem:[%s2295_s28 + $0x18] sm:$0xff]  ;;  %1934 = vmatprep.mubr.bf16.mxu0 %v2298_v0  ;;  %v537_v8 = vld [vmem:[%s2295_s28 + $0x28] sm:$0xff]  ;;  %s514_s29 = scalar_lea.vmem %s2486_s15, %s1759_s24 }
  0x12   : > { %v548_v4 = vpack.c.bf16 %v533_v2, %v532_v1  ;;  %v549_v6 = vpack.c.bf16 %v535_v5, %v534_v3  ;;  %v536_v7 = vld [vmem:[%s2295_s28 + $0x20] sm:$0xff]  ;;  %v538_v10 = vld [vmem:[%s2295_s28 + $0x30] sm:$0xff]  ;;  %v539_v11 = vld [vmem:[%s2295_s28 + $0x38] sm:$0xff] }
  0x13   : > { %v550_v9 = vpack.c.bf16 %v537_v8, %v536_v7  ;;  %v551_v12 = vpack.c.bf16 %v539_v11, %v538_v10  ;;  %v540_v13 = vld [vmem:[%s2295_s28 + $0x40] sm:$0xff]  ;;  %v541_v14 = vld [vmem:[%s2295_s28 + $0x48] sm:$0xff]  ;;  %v542_v15 = vld [vmem:[%s2295_s28 + $0x50] sm:$0xff] }
  0x14   : > { %1918 = vmatprep.subr.bf16.mxu0 %v548_v4  ;;  %v543_v16 = vld [vmem:[%s2295_s28 + $0x58] sm:$0xff]  ;;  %v552_v17 = vpack.c.bf16 %v541_v14, %v540_v13  ;;  %v544_v19 = vld [vmem:[%s2295_s28 + $0x60] sm:$0xff]  ;;  %v545_v20 = vld [vmem:[%s2295_s28 + $0x68] sm:$0xff] }
  0x15   : > { %1919 = vmatpush3.bf16.msra.mxu0 %v548_v4  ;;  %v553_v18 = vpack.c.bf16 %v543_v16, %v542_v15  ;;  %v554_v21 = vpack.c.bf16 %v545_v20, %v544_v19  ;;  %v546_v22 = vld [vmem:[%s2295_s28 + $0x70] sm:$0xff]  ;;  %v547_v23 = vld [vmem:[%s2295_s28 + $0x78] sm:$0xff]  ;;  %v2318_v25 = vld [vmem:[%s2290_s25 + $0x8] sm:$0xff]  }
  0x16   : > { %1920 = vmatprep.subr.bf16.mxu0 %v549_v6  ;;  %v555_v24 = vpack.c.bf16 %v547_v23, %v546_v22  ;;  %v2321_v26 = vld [vmem:[%s2290_s25 + $0x10] sm:$0xff]   ;;  %v2326_v27 = vld [vmem:[%s2290_s25 + $0x18] sm:$0xff]   ;;  %v2329_v28 = vld [vmem:[%s2290_s25 + $0x20] sm:$0xff]  }
  0x17   : > { %v2334_v29 = vld [vmem:[%s2290_s25 + $0x28] sm:$0xff]   ;;  %v2337_v30 = vld [vmem:[%s2290_s25 + $0x30] sm:$0xff]   ;;  %v2342_v31 = vld [vmem:[%s2290_s25 + $0x38] sm:$0xff]  }
  0x19   : > { %1921 = vmatpush3.bf16.msra.mxu0 %v549_v6 }
  0x1a   : > { %1922 = vmatprep.subr.bf16.mxu0 %v550_v9 }
  0x1d   : > { %1923 = vmatpush3.bf16.msra.mxu0 %v550_v9 }
  0x1e   : > { %1924 = vmatprep.subr.bf16.mxu0 %v551_v12 }
  0x21   : > { %1925 = vmatpush3.bf16.msra.mxu0 %v551_v12 }
  0x22   : > { %1926 = vmatprep.subr.bf16.mxu0 %v552_v17 }
  0x25   : > { %1927 = vmatpush3.bf16.msra.mxu0 %v552_v17 }
  0x26   : > { %1928 = vmatprep.subr.bf16.mxu0 %v553_v18 }
  0x29   : > { %1929 = vmatpush3.bf16.msra.mxu0 %v553_v18 }
  0x2a   : > { %1930 = vmatprep.subr.bf16.mxu0 %v554_v21 }
  0x2d   : > { %1931 = vmatpush3.bf16.msra.mxu0 %v554_v21 }
  0x2e   : > { %1932 = vmatprep.subr.bf16.mxu0 %v555_v24 }
  0x31   : > { %1933 = vmatpush3.bf16.msra.mxu0 %v555_v24 }
  0x34   : > { %1935 = vmatmul.mubr.bf16.vlgmr.msra.gmra.mrb[0].mxu0 %v2318_v25 }
  0x35   : > { %1938 = vmatprep.mubr.bf16.mxu0 %v2321_v26 }
  0x3c   : > { %1939 = vmatmul.mubr.bf16.gmra.mrb[4].mxu0 %v2326_v27 }
  0x3d   : > { %1942 = vmatprep.mubr.bf16.mxu0 %v2329_v28 }
  0x44   : > { %1943 = vmatmul.mubr.bf16.gmra.mrb[8].mxu0 %v2334_v29 }
  0x45   : > { %1946 = vmatprep.mubr.bf16.mxu0 %v2337_v30 }
  0x4c   : > { %1947 = vmatmul.mubr.bf16.gmra.mrb[12].mxu0 %v2342_v31 }
  0x4d   : > { %2004 = vmatprep.mubr.bf16.mxu0 %v2298_v0 }
 0x107   : > { %v1936_v34 = vpop.f32.mrb[0].mxu0 }
 0x108   : > { %v638_v35 = vpop.f32.mrb[1].mxu0 }
 0x109   : > { %v1937_v36 = vpop.f32.mrb[2].mxu0 }
 0x10a   : > { %v702_v37 = vpack.c.bf16 %v1937_v36, %v1936_v34  ;;  %v641_v38 = vpop.f32.mrb[3].mxu0 }
 0x10b   : > { %v701_v39 = vpack.c.bf16 %v641_v38, %v638_v35 }
 0x10d   : > { %1952 = vmatprep.mubr.msk.bf16.mxu1 %vm724_vm0, %v701_v39 }
 0x10e   : > { %1953 = vmatmul.mubr.msk.bf16.vlgmr.msra.gmra.mrb[0].mxu1 %vm724_vm0, %v702_v37 }
 0x10f   : > { %v1940_v41 = vpop.f32.mrb[4].mxu0  ;;  %1969 = vmatpush3.bf16.msra.mxu1 %v2175_v33 }
 0x110   : > { %v654_v42 = vpop.f32.mrb[5].mxu0  ;;  %1970 = vmatprep.subr.bf16.mxu1 %v2176_v40 }
 0x111   : > { %v1941_v43 = vpop.f32.mrb[6].mxu0 }
 0x112   : > { %v704_v44 = vpack.c.bf16 %v1941_v43, %v1940_v41  ;;  %v657_v45 = vpop.f32.mrb[7].mxu0 }
 0x113   : > { %v703_v46 = vpack.c.bf16 %v657_v45, %v654_v42  ;;  %1971 = vmatpush3.bf16.msra.mxu1 %v2176_v40 }
 0x115   : > { %1956 = vmatprep.mubr.msk.bf16.mxu1 %vm724_vm0, %v703_v46 }
 0x116   : > { %1957 = vmatmul.mubr.msk.bf16.gmra.mrb[4].mxu1 %vm724_vm0, %v704_v44 }
 0x117   : > { %v1944_v47 = vpop.f32.mrb[8].mxu0 }
 0x118   : > { %v670_v48 = vpop.f32.mrb[9].mxu0 }
 0x119   : > { %v1945_v49 = vpop.f32.mrb[10].mxu0 }
 0x11a   : > { %v706_v50 = vpack.c.bf16 %v1945_v49, %v1944_v47  ;;  %v673_v51 = vpop.f32.mrb[11].mxu0 }
 0x11b   : > { %v705_v52 = vpack.c.bf16 %v673_v51, %v670_v48 }
 0x11d   : > { %1960 = vmatprep.mubr.msk.bf16.mxu1 %vm724_vm0, %v705_v52 }
 0x11e   : > { %1961 = vmatmul.mubr.msk.bf16.gmra.mrb[8].mxu1 %vm724_vm0, %v706_v50 }
 0x11f   : > { %v1948_v53 = vpop.f32.mrb[12].mxu0 }
 0x120   : > { %v686_v54 = vpop.f32.mrb[13].mxu0 }
 0x121   : > { %v1949_v55 = vpop.f32.mrb[14].mxu0 }
 0x122   : > { %v708_v56 = vpack.c.bf16 %v1949_v55, %v1948_v53  ;;  %v689_v57 = vpop.f32.mrb[15].mxu0 }
 0x123   : > { %v707_v58 = vpack.c.bf16 %v689_v57, %v686_v54 }
 0x125   : > { %1964 = vmatprep.mubr.msk.bf16.mxu1 %vm724_vm0, %v707_v58 }
 0x126   : > { %1965 = vmatmul.mubr.msk.bf16.gmra.mrb[12].mxu1 %vm724_vm0, %v708_v56 }
 0x1e1   : > { %v1954_v60 = vpop.f32.mrb[0].mxu1 }
 0x1e2   : > { %v792_v61 = vadd.f32 %v1954_v60, %v1768_v59  ;;  %v783_v62 = vpop.f32.mrb[1].mxu1 }
 0x1e3   : > { %v784_v63 = vadd.f32 %v1768_v59, %v783_v62  ;;  %v1955_v1 = vpop.f32.mrb[2].mxu1  ;;  %v2178_v62 = vld [vmem:[%s2478_s7 + $0x8] sm:$0xff]  }
 0x1e4   : > { %v795_v2 = vadd.f32 %v1955_v1, %v1768_v59  ;;  %v786_v3 = vpop.f32.mrb[3].mxu1  ;;  %v848_v5 = vmax.f32 %v792_v61, 0.0  ;;  %v2177_v61 = vld [vmem:[%s2478_s7] sm:$0xff]  }
 0x1e5   : > { %v787_v4 = vadd.f32 %v1768_v59, %v786_v3  ;;  %v846_v7 = vmax.f32 %v784_v63, 0.0  ;;  %2020 = vmatprep.subr.bf16.mxu1 %v2177_v61 }
 0x1e6   : > { %v849_v6 = vmax.f32 %v795_v2, 0.0 }
 0x1e7   : > { %v847_v8 = vmax.f32 %v787_v4, 0.0 }
 0x1e8   : > { %v863_v9 = vpack.c.bf16 %v849_v6, %v848_v5 }
 0x1e9   : > { %v862_v10 = vpack.c.bf16 %v847_v8, %v846_v7  ;;  %v1958_v11 = vpop.f32.mrb[4].mxu1 }
 0x1ea   : > { %v808_v12 = vadd.f32 %v1958_v11, %v1768_v59  ;;  %v799_v13 = vpop.f32.mrb[5].mxu1 }
 0x1eb   : > { %v800_v14 = vadd.f32 %v1768_v59, %v799_v13  ;;  %v1959_v15 = vpop.f32.mrb[6].mxu1  ;;  %1972 = vmatprep.mubr.msk.bf16.mxu1 %vm886_vm1, %v862_v10 }
 0x1ec   : > { %v811_v16 = vadd.f32 %v1959_v15, %v1768_v59  ;;  %v802_v17 = vpop.f32.mrb[7].mxu1  ;;  %1973 = vmatmul.mubr.msk.bf16.vlgmr.msra.gmra.mrb[16].mxu1 %vm886_vm1, %v863_v9  ;;  %v852_v19 = vmax.f32 %v808_v12, 0.0 }
 0x1ed   : > { %v803_v18 = vadd.f32 %v1768_v59, %v802_v17  ;;  %v850_v21 = vmax.f32 %v800_v14, 0.0  ;;  %2021 = vmatpush3.bf16.msra.mxu1 %v2177_v61 }
 0x1ee   : > { %v853_v20 = vmax.f32 %v811_v16, 0.0  ;;  %2022 = vmatprep.subr.bf16.mxu1 %v2178_v62 }
 0x1ef   : > { %v851_v22 = vmax.f32 %v803_v18, 0.0 }
 0x1f0   : > { %v865_v23 = vpack.c.bf16 %v853_v20, %v852_v19 }
 0x1f1   : > { %v864_v24 = vpack.c.bf16 %v851_v22, %v850_v21  ;;  %v1962_v32 = vpop.f32.mrb[8].mxu1  ;;  %2023 = vmatpush3.bf16.msra.mxu1 %v2178_v62 }
 0x1f2   : > { %v824_v33 = vadd.f32 %v1962_v32, %v1768_v59  ;;  %v815_v34 = vpop.f32.mrb[9].mxu1 }
 0x1f3   : > { %v816_v35 = vadd.f32 %v1768_v59, %v815_v34  ;;  %v1963_v36 = vpop.f32.mrb[10].mxu1  ;;  %1976 = vmatprep.mubr.msk.bf16.mxu1 %vm886_vm1, %v864_v24 }
 0x1f4   : > { %v827_v37 = vadd.f32 %v1963_v36, %v1768_v59  ;;  %v818_v38 = vpop.f32.mrb[11].mxu1  ;;  %1977 = vmatmul.mubr.msk.bf16.gmra.mrb[20].mxu1 %vm886_vm1, %v865_v23  ;;  %v856_v40 = vmax.f32 %v824_v33, 0.0  ;;  %v1788_v23 = vld [vmem:[%s2477_s6] ss:$0 sm:$0xff] }
 0x1f5   : > { %v819_v39 = vadd.f32 %v1768_v59, %v818_v38  ;;  %v854_v42 = vmax.f32 %v816_v35, 0.0 }
 0x1f6   : > { %v857_v41 = vmax.f32 %v827_v37, 0.0 }
 0x1f7   : > { %v855_v43 = vmax.f32 %v819_v39, 0.0 }
 0x1f8   : > { %v867_v44 = vpack.c.bf16 %v857_v41, %v856_v40 }
 0x1f9   : > { %v866_v45 = vpack.c.bf16 %v855_v43, %v854_v42  ;;  %v1966_v46 = vpop.f32.mrb[12].mxu1 }
 0x1fa   : > { %v840_v47 = vadd.f32 %v1966_v46, %v1768_v59  ;;  %v831_v48 = vpop.f32.mrb[13].mxu1 }
 0x1fb   : > { %v832_v49 = vadd.f32 %v1768_v59, %v831_v48  ;;  %v1967_v50 = vpop.f32.mrb[14].mxu1  ;;  %1980 = vmatprep.mubr.msk.bf16.mxu1 %vm886_vm1, %v866_v45 }
 0x1fc   : > { %v843_v51 = vadd.f32 %v1967_v50, %v1768_v59  ;;  %v834_v52 = vpop.f32.mrb[15].mxu1  ;;  %1981 = vmatmul.mubr.msk.bf16.gmra.mrb[24].mxu1 %vm886_vm1, %v867_v44  ;;  %v860_v54 = vmax.f32 %v840_v47, 0.0 }
 0x1fd   : > { %v835_v53 = vadd.f32 %v1768_v59, %v834_v52  ;;  %v858_v56 = vmax.f32 %v832_v49, 0.0 }
 0x1fe   : > { %v861_v55 = vmax.f32 %v843_v51, 0.0 }
 0x1ff   : > { %v859_v57 = vmax.f32 %v835_v53, 0.0 }
 0x200   : > { %v869_v58 = vpack.c.bf16 %v861_v55, %v860_v54 }
 0x201   : > { %v868_v60 = vpack.c.bf16 %v859_v57, %v858_v56 }
 0x203   : > { %1984 = vmatprep.mubr.msk.bf16.mxu1 %vm886_vm1, %v868_v60 }
 0x204   : > { %1985 = vmatmul.mubr.msk.bf16.gmra.mrb[28].mxu1 %vm886_vm1, %v869_v58 }
 0x2bf   : > { %v1974_v59 = vpop.f32.mrb[16].mxu1 }
 0x2c0   : > { %v945_v63 = vpop.f32.mrb[17].mxu1 }
 0x2c1   : > { %v1975_v1 = vpop.f32.mrb[18].mxu1 }
 0x2c2   : > { %v1009_v2 = vpack.c.bf16 %v1975_v1, %v1974_v59  ;;  %v948_v3 = vpop.f32.mrb[19].mxu1 }
 0x2c3   : > { %v1008_v4 = vpack.c.bf16 %v948_v3, %v945_v63 }
 0x2c5   : > { %1988 = vmatprep.subr.bf16.mxu0 %v1008_v4 }
 0x2c6   : > { %1989 = vmatpush3.bf16.msra.mxu0 %v1008_v4 }
 0x2c7   : > { %v1978_v5 = vpop.f32.mrb[20].mxu1  ;;  %1990 = vmatprep.subr.bf16.mxu0 %v1009_v2 }
 0x2c8   : > { %v961_v6 = vpop.f32.mrb[21].mxu1 }
 0x2c9   : > { %v1979_v7 = vpop.f32.mrb[22].mxu1 }
 0x2ca   : > { %v1011_v8 = vpack.c.bf16 %v1979_v7, %v1978_v5  ;;  %v964_v9 = vpop.f32.mrb[23].mxu1  ;;  %1991 = vmatpush3.bf16.msra.mxu0 %v1009_v2 }
 0x2cb   : > { %v1010_v10 = vpack.c.bf16 %v964_v9, %v961_v6 }
 0x2cd   : > { %1992 = vmatprep.subr.bf16.mxu0 %v1010_v10 }
 0x2ce   : > { %1993 = vmatpush3.bf16.msra.mxu0 %v1010_v10 }
 0x2cf   : > { %v1982_v11 = vpop.f32.mrb[24].mxu1  ;;  %1994 = vmatprep.subr.bf16.mxu0 %v1011_v8 }
 0x2d0   : > { %v977_v12 = vpop.f32.mrb[25].mxu1 }
 0x2d1   : > { %v1983_v13 = vpop.f32.mrb[26].mxu1 }
 0x2d2   : > { %v1013_v14 = vpack.c.bf16 %v1983_v13, %v1982_v11  ;;  %v980_v15 = vpop.f32.mrb[27].mxu1  ;;  %1995 = vmatpush3.bf16.msra.mxu0 %v1011_v8 }
 0x2d3   : > { %v1012_v16 = vpack.c.bf16 %v980_v15, %v977_v12 }
 0x2d5   : > { %1996 = vmatprep.subr.bf16.mxu0 %v1012_v16 }
 0x2d6   : > { %1997 = vmatpush3.bf16.msra.mxu0 %v1012_v16 }
 0x2d7   : > { %v1986_v17 = vpop.f32.mrb[28].mxu1  ;;  %1998 = vmatprep.subr.bf16.mxu0 %v1013_v14 }
 0x2d8   : > { %v993_v18 = vpop.f32.mrb[29].mxu1 }
 0x2d9   : > { %v1987_v19 = vpop.f32.mrb[30].mxu1 }
 0x2da   : > { %v1015_v20 = vpack.c.bf16 %v1987_v19, %v1986_v17  ;;  %v996_v21 = vpop.f32.mrb[31].mxu1  ;;  %1999 = vmatpush3.bf16.msra.mxu0 %v1013_v14 }
 0x2db   : > { %v1014_v22 = vpack.c.bf16 %v996_v21, %v993_v18 }
 0x2dd   : > { %2000 = vmatprep.subr.bf16.mxu0 %v1014_v22 }
 0x2de   : > { %2001 = vmatpush3.bf16.msra.mxu0 %v1014_v22 }
 0x2df   : > { %2002 = vmatprep.subr.bf16.mxu0 %v1015_v20 }
 0x2e2   : > { %2003 = vmatpush3.bf16.msra.mxu0 %v1015_v20 }
 0x2e5   : > { %2005 = vmatmul.mubr.bf16.vlgmr.msra.gmra.mrb[16].mxu0 %v2318_v25 }
 0x2e6   : > { %2008 = vmatprep.mubr.bf16.mxu0 %v2321_v26 }
 0x2ed   : > { %2009 = vmatmul.mubr.bf16.gmra.mrb[20].mxu0 %v2326_v27 }
 0x2ee   : > { %2012 = vmatprep.mubr.bf16.mxu0 %v2329_v28 }
 0x2f5   : > { %2013 = vmatmul.mubr.bf16.gmra.mrb[24].mxu0 %v2334_v29 }
 0x2f6   : > { %2016 = vmatprep.mubr.bf16.mxu0 %v2337_v30 }
 0x2fd   : > { %2017 = vmatmul.mubr.bf16.gmra.mrb[28].mxu0 %v2342_v31 }
 0x2fe   : > { %2056 = vmatprep.mubr.bf16.mxu0 %v2298_v0 }
 0x3b8   : > { %v2006_v24 = vpop.f32.mrb[16].mxu0 }
 0x3b9   : > { %v1066_v32 = vadd.f32 %v2006_v24, %v1788_v23  ;;  %v1057_v33 = vpop.f32.mrb[17].mxu0 }
 0x3ba   : > { %v1058_v34 = vadd.f32 %v1788_v23, %v1057_v33  ;;  %v2007_v35 = vpop.f32.mrb[18].mxu0 }
 0x3bb   : > { %v1069_v36 = vadd.f32 %v2007_v35, %v1788_v23  ;;  %v1060_v37 = vpop.f32.mrb[19].mxu0  ;;  %v1122_v39 = vmax.f32 %v1066_v32, 0.0 }
 0x3bc   : > { %v1061_v38 = vadd.f32 %v1788_v23, %v1060_v37  ;;  %v1120_v41 = vmax.f32 %v1058_v34, 0.0 }
 0x3bd   : > { %v1123_v40 = vmax.f32 %v1069_v36, 0.0 }
 0x3be   : > { %v1121_v42 = vmax.f32 %v1061_v38, 0.0 }
 0x3bf   : > { %v1137_v43 = vpack.c.bf16 %v1123_v40, %v1122_v39 }
 0x3c0   : > { %v1136_v44 = vpack.c.bf16 %v1121_v42, %v1120_v41  ;;  %v2010_v45 = vpop.f32.mrb[20].mxu0 }
 0x3c1   : > { %v1082_v0 = vadd.f32 %v2010_v45, %v1788_v23  ;;  %v1073_v46 = vpop.f32.mrb[21].mxu0 }
 0x3c2   : > { %v1074_v47 = vadd.f32 %v1788_v23, %v1073_v46  ;;  %v2011_v48 = vpop.f32.mrb[22].mxu0  ;;  %2024 = vmatprep.mubr.msk.bf16.mxu1 %vm886_vm1, %v1136_v44 }
 0x3c3   : > { %v1085_v49 = vadd.f32 %v2011_v48, %v1788_v23  ;;  %v1076_v50 = vpop.f32.mrb[23].mxu0  ;;  %2025 = vmatmul.mubr.msk.bf16.vlgmr.msra.gmra.mrb[32].mxu1 %vm886_vm1, %v1137_v43  ;;  %v1126_v52 = vmax.f32 %v1082_v0, 0.0 }
 0x3c4   : > { %v1077_v51 = vadd.f32 %v1788_v23, %v1076_v50  ;;  %v1124_v54 = vmax.f32 %v1074_v47, 0.0 }
 0x3c5   : > { %v1127_v53 = vmax.f32 %v1085_v49, 0.0 }
 0x3c6   : > { %v1125_v55 = vmax.f32 %v1077_v51, 0.0 }
 0x3c7   : > { %v1139_v56 = vpack.c.bf16 %v1127_v53, %v1126_v52  ;;  %v2193_v53 = vmov 0.0|0.0  }
 0x3c8   : > { %v1138_v57 = vpack.c.bf16 %v1125_v55, %v1124_v54  ;;  %v2014_v58 = vpop.f32.mrb[24].mxu0  ;;  %2131 = vmatprep.subr.bf16.mxu1 %v2193_v53  ;;  %v2195_v54 = vmov 0.0  }
 0x3c9   : > { %v1098_v60 = vadd.f32 %v2014_v58, %v1788_v23  ;;  %v1089_v61 = vpop.f32.mrb[25].mxu0 }
 0x3ca   : > { %v1090_v62 = vadd.f32 %v1788_v23, %v1089_v61  ;;  %v2015_v59 = vpop.f32.mrb[26].mxu0  ;;  %2028 = vmatprep.mubr.msk.bf16.mxu1 %vm886_vm1, %v1138_v57 }
 0x3cb   : > { %v1101_v63 = vadd.f32 %v2015_v59, %v1788_v23  ;;  %v1092_v1 = vpop.f32.mrb[27].mxu0  ;;  %2029 = vmatmul.mubr.msk.bf16.gmra.mrb[36].mxu1 %vm886_vm1, %v1139_v56  ;;  %v1130_v3 = vmax.f32 %v1098_v60, 0.0 }
 0x3cc   : > { %v1093_v2 = vadd.f32 %v1788_v23, %v1092_v1  ;;  %v1128_v5 = vmax.f32 %v1090_v62, 0.0 }
 0x3cd   : > { %v1131_v4 = vmax.f32 %v1101_v63, 0.0 }
 0x3ce   : > { %v1129_v6 = vmax.f32 %v1093_v2, 0.0 }
 0x3cf   : > { %v1141_v7 = vpack.c.bf16 %v1131_v4, %v1130_v3 }
 0x3d0   : > { %v1140_v8 = vpack.c.bf16 %v1129_v6, %v1128_v5  ;;  %v2018_v9 = vpop.f32.mrb[28].mxu0 }
 0x3d1   : > { %v1114_v10 = vadd.f32 %v2018_v9, %v1788_v23  ;;  %v1105_v11 = vpop.f32.mrb[29].mxu0 }
 0x3d2   : > { %v1106_v12 = vadd.f32 %v1788_v23, %v1105_v11  ;;  %v2019_v13 = vpop.f32.mrb[30].mxu0  ;;  %2032 = vmatprep.mubr.msk.bf16.mxu1 %vm886_vm1, %v1140_v8 }
 0x3d3   : > { %v1117_v14 = vadd.f32 %v2019_v13, %v1788_v23  ;;  %v1108_v15 = vpop.f32.mrb[31].mxu0  ;;  %2033 = vmatmul.mubr.msk.bf16.gmra.mrb[40].mxu1 %vm886_vm1, %v1141_v7  ;;  %v1134_v17 = vmax.f32 %v1114_v10, 0.0 }
 0x3d4   : > { %v1109_v16 = vadd.f32 %v1788_v23, %v1108_v15  ;;  %v1132_v19 = vmax.f32 %v1106_v12, 0.0 }
 0x3d5   : > { %v1135_v18 = vmax.f32 %v1117_v14, 0.0 }
 0x3d6   : > { %v1133_v20 = vmax.f32 %v1109_v16, 0.0 }
 0x3d7   : > { %v1143_v21 = vpack.c.bf16 %v1135_v18, %v1134_v17 }
 0x3d8   : > { %v1142_v22 = vpack.c.bf16 %v1133_v20, %v1132_v19 }
 0x3da   : > { %2036 = vmatprep.mubr.msk.bf16.mxu1 %vm886_vm1, %v1142_v22 }
 0x3db   : > { %2037 = vmatmul.mubr.msk.bf16.gmra.mrb[44].mxu1 %vm886_vm1, %v1143_v21 }
 0x3dc   : > { %2104 = vmatprep.mubr.msk.f32.mxu1 %vm2194_vm2, %v2195_v54 }
 0x496   : > { %v2026_v24 = vpop.f32.mrb[32].mxu1 }
 0x497   : > { %v1218_v32 = vpop.f32.mrb[33].mxu1 }
 0x498   : > { %v2027_v33 = vpop.f32.mrb[34].mxu1 }
 0x499   : > { %v1282_v34 = vpack.c.bf16 %v2027_v33, %v2026_v24  ;;  %v1221_v35 = vpop.f32.mrb[35].mxu1 }
 0x49a   : > { %v1281_v36 = vpack.c.bf16 %v1221_v35, %v1218_v32 }
 0x49c   : > { %2040 = vmatprep.subr.bf16.mxu0 %v1281_v36 }
 0x49d   : > { %2041 = vmatpush3.bf16.msra.mxu0 %v1281_v36 }
 0x49e   : > { %v2030_v37 = vpop.f32.mrb[36].mxu1  ;;  %2042 = vmatprep.subr.bf16.mxu0 %v1282_v34 }
 0x49f   : > { %v1234_v23 = vpop.f32.mrb[37].mxu1 }
 0x4a0   : > { %v2031_v38 = vpop.f32.mrb[38].mxu1 }
 0x4a1   : > { %v1284_v39 = vpack.c.bf16 %v2031_v38, %v2030_v37  ;;  %v1237_v40 = vpop.f32.mrb[39].mxu1  ;;  %2043 = vmatpush3.bf16.msra.mxu0 %v1282_v34 }
 0x4a2   : > { %v1283_v41 = vpack.c.bf16 %v1237_v40, %v1234_v23 }
 0x4a4   : > { %2044 = vmatprep.subr.bf16.mxu0 %v1283_v41 }
 0x4a5   : > { %2045 = vmatpush3.bf16.msra.mxu0 %v1283_v41 }
 0x4a6   : > { %v2034_v42 = vpop.f32.mrb[40].mxu1  ;;  %2046 = vmatprep.subr.bf16.mxu0 %v1284_v39 }
 0x4a7   : > { %v1250_v43 = vpop.f32.mrb[41].mxu1 }
 0x4a8   : > { %v2035_v44 = vpop.f32.mrb[42].mxu1 }
 0x4a9   : > { %v1286_v45 = vpack.c.bf16 %v2035_v44, %v2034_v42  ;;  %v1253_v0 = vpop.f32.mrb[43].mxu1  ;;  %2047 = vmatpush3.bf16.msra.mxu0 %v1284_v39 }
 0x4aa   : > { %v1285_v46 = vpack.c.bf16 %v1253_v0, %v1250_v43 }
 0x4ac   : > { %2048 = vmatprep.subr.bf16.mxu0 %v1285_v46 }
 0x4ad   : > { %2049 = vmatpush3.bf16.msra.mxu0 %v1285_v46 }
 0x4ae   : > { %v2038_v47 = vpop.f32.mrb[44].mxu1  ;;  %2050 = vmatprep.subr.bf16.mxu0 %v1286_v45 }
 0x4af   : > { %v1266_v48 = vpop.f32.mrb[45].mxu1 }
 0x4b0   : > { %v2039_v49 = vpop.f32.mrb[46].mxu1 }
 0x4b1   : > { %v1288_v50 = vpack.c.bf16 %v2039_v49, %v2038_v47  ;;  %v1269_v51 = vpop.f32.mrb[47].mxu1  ;;  %2051 = vmatpush3.bf16.msra.mxu0 %v1286_v45  ;;  %v2179_v49 = vld [vmem:[%s2480_s9] sm:$0xff]  }
 0x4b2   : > { %v1287_v52 = vpack.c.bf16 %v1269_v51, %v1266_v48  ;;  %v1409_v48 = vld [vmem:[%s2473_s2] sm:$0xff] }
 0x4b4   : > { %2052 = vmatprep.subr.bf16.mxu0 %v1287_v52 }
 0x4b5   : > { %2053 = vmatpush3.bf16.msra.mxu0 %v1287_v52 }
 0x4b6   : > { %2054 = vmatprep.subr.bf16.mxu0 %v1288_v50 }
 0x4b9   : > { %2055 = vmatpush3.bf16.msra.mxu0 %v1288_v50  ;;  %v2180_v50 = vld [vmem:[%s2480_s9 + $0x8] sm:$0xff]  }
 0x4bc   : > { %2057 = vmatmul.mubr.bf16.vlgmr.msra.gmra.mrb[32].mxu0 %v2318_v25  ;;  %v1799_v25 = vld [vmem:[%s2479_s8] ss:$0 sm:$0xff] }
 0x4bd   : > { %2060 = vmatprep.mubr.bf16.mxu0 %v2321_v26 }
 0x4c4   : > { %2061 = vmatmul.mubr.bf16.gmra.mrb[36].mxu0 %v2326_v27 }
 0x4c5   : > { %2064 = vmatprep.mubr.bf16.mxu0 %v2329_v28 }
 0x4cc   : > { %2065 = vmatmul.mubr.bf16.gmra.mrb[40].mxu0 %v2334_v29 }
 0x4cd   : > { %2068 = vmatprep.mubr.bf16.mxu0 %v2337_v30 }
 0x4d4   : > { %2069 = vmatmul.mubr.bf16.gmra.mrb[44].mxu0 %v2342_v31 }
 0x58f   : > { %v2058_v26 = vpop.f32.mrb[32].mxu0 }
 0x590   : > { %v1339_v27 = vadd.f32 %v2058_v26, %v1799_v25  ;;  %v1330_v28 = vpop.f32.mrb[33].mxu0  ;;  %v2182_v26 = vld [vmem:[%s2482_s11 + $0x8] sm:$0xff]  }
 0x591   : > { %v1331_v29 = vadd.f32 %v1799_v25, %v1330_v28  ;;  %v2059_v55 = vpop.f32.mrb[34].mxu0 }
 0x592   : > { %v1342_v30 = vadd.f32 %v2059_v55, %v1799_v25  ;;  %v1333_v56 = vpop.f32.mrb[35].mxu0  ;;  %v1395_v57 = vmax.f32 %v1339_v27, 0.0  ;;  %v1800_v27 = vld [vmem:[%s2481_s10] ss:$0 sm:$0xff] }
 0x593   : > { %v1334_v31 = vadd.f32 %v1799_v25, %v1333_v56  ;;  %v1393_v60 = vmax.f32 %v1331_v29, 0.0 }
 0x594   : > { %v1396_v58 = vmax.f32 %v1342_v30, 0.0 }
 0x595   : > { %v1394_v61 = vmax.f32 %v1334_v31, 0.0 }
 0x596   : > { %v2135_v62 = vpack.c.bf16 %v1396_v58, %v1395_v57  ;;  %v2183_v58 = vld [vmem:[%s2484_s13] sm:$0xff]  }
 0x597   : > { %v2132_v59 = vpack.c.bf16 %v1394_v61, %v1393_v60  ;;  %v2062_v63 = vpop.f32.mrb[36].mxu0  ;;  %v2184_v60 = vld [vmem:[%s2484_s13 + $0x8] sm:$0xff]   ;;  %v1804_v61 = vld [vmem:[%s2483_s12] ss:$0 sm:$0xff] }
 0x598   : > { %v1355_v1 = vadd.f32 %v2062_v63, %v1799_v25  ;;  %v1346_v2 = vpop.f32.mrb[37].mxu0 }
 0x599   : > { %v1347_v3 = vadd.f32 %v1799_v25, %v1346_v2  ;;  %v2063_v4 = vpop.f32.mrb[38].mxu0  ;;  %2133 = vmatpush3.bf16.msra.mxu1 %v2132_v59 }
 0x59a   : > { %v1358_v5 = vadd.f32 %v2063_v4, %v1799_v25  ;;  %v1349_v6 = vpop.f32.mrb[39].mxu0  ;;  %2134 = vmatprep.subr.bf16.mxu1 %v2193_v53  ;;  %v1399_v8 = vmax.f32 %v1355_v1, 0.0 }
 0x59b   : > { %v1350_v7 = vadd.f32 %v1799_v25, %v1349_v6  ;;  %v1397_v10 = vmax.f32 %v1347_v3, 0.0 }
 0x59c   : > { %v1400_v9 = vmax.f32 %v1358_v5, 0.0 }
 0x59d   : > { %v1398_v11 = vmax.f32 %v1350_v7, 0.0  ;;  %2136 = vmatpush3.bf16.msra.mxu1 %v2135_v62 }
 0x59e   : > { %v2141_v12 = vpack.c.bf16 %v1400_v9, %v1399_v8  ;;  %2137 = vmatprep.subr.bf16.mxu1 %v2193_v53 }
 0x59f   : > { %v2138_v13 = vpack.c.bf16 %v1398_v11, %v1397_v10  ;;  %v2066_v14 = vpop.f32.mrb[40].mxu0 }
 0x5a0   : > { %v1371_v15 = vadd.f32 %v2066_v14, %v1799_v25  ;;  %v1362_v16 = vpop.f32.mrb[41].mxu0 }
 0x5a1   : > { %v1363_v17 = vadd.f32 %v1799_v25, %v1362_v16  ;;  %v2067_v18 = vpop.f32.mrb[42].mxu0  ;;  %2139 = vmatpush3.bf16.msra.mxu1 %v2138_v13 }
 0x5a2   : > { %v1374_v19 = vadd.f32 %v2067_v18, %v1799_v25  ;;  %v1365_v20 = vpop.f32.mrb[43].mxu0  ;;  %2140 = vmatprep.subr.bf16.mxu1 %v2193_v53  ;;  %v1403_v22 = vmax.f32 %v1371_v15, 0.0 }
 0x5a3   : > { %v1366_v21 = vadd.f32 %v1799_v25, %v1365_v20  ;;  %v1401_v32 = vmax.f32 %v1363_v17, 0.0 }
 0x5a4   : > { %v1404_v24 = vmax.f32 %v1374_v19, 0.0 }
 0x5a5   : > { %v1402_v33 = vmax.f32 %v1366_v21, 0.0  ;;  %2142 = vmatpush3.bf16.msra.mxu1 %v2141_v12 }
 0x5a6   : > { %v2147_v34 = vpack.c.bf16 %v1404_v24, %v1403_v22  ;;  %2143 = vmatprep.subr.bf16.mxu1 %v2193_v53 }
 0x5a7   : > { %v2144_v35 = vpack.c.bf16 %v1402_v33, %v1401_v32  ;;  %v2070_v36 = vpop.f32.mrb[44].mxu0 }
 0x5a8   : > { %v1387_v37 = vadd.f32 %v2070_v36, %v1799_v25  ;;  %v1378_v23 = vpop.f32.mrb[45].mxu0 }
 0x5a9   : > { %v1379_v38 = vadd.f32 %v1799_v25, %v1378_v23  ;;  %v2071_v39 = vpop.f32.mrb[46].mxu0  ;;  %2145 = vmatpush3.bf16.msra.mxu1 %v2144_v35 }
 0x5aa   : > { %v1390_v40 = vadd.f32 %v2071_v39, %v1799_v25  ;;  %v1381_v41 = vpop.f32.mrb[47].mxu0  ;;  %2146 = vmatprep.subr.bf16.mxu1 %v2193_v53  ;;  %v1407_v43 = vmax.f32 %v1387_v37, 0.0 }
 0x5ab   : > { %v1382_v42 = vadd.f32 %v1799_v25, %v1381_v41  ;;  %v1405_v45 = vmax.f32 %v1379_v38, 0.0  ;;  %v2181_v25 = vld [vmem:[%s2482_s11] sm:$0xff]  }
 0x5ac   : > { %v1408_v44 = vmax.f32 %v1390_v40, 0.0 }
 0x5ad   : > { %v1406_v0 = vmax.f32 %v1382_v42, 0.0  ;;  %2148 = vmatpush3.bf16.msra.mxu1 %v2147_v34 }
 0x5ae   : > { %v2153_v46 = vpack.c.bf16 %v1408_v44, %v1407_v43  ;;  %2149 = vmatprep.subr.bf16.mxu1 %v2193_v53 }
 0x5af   : > { %v2150_v47 = vpack.c.bf16 %v1406_v0, %v1405_v45 }
 0x5b1   : > { %2151 = vmatpush3.bf16.msra.mxu1 %v2150_v47 }
 0x5b2   : > { %2152 = vmatprep.subr.bf16.mxu1 %v2193_v53 }
 0x5b5   : > { %2154 = vmatpush3.bf16.msra.mxu1 %v2153_v46 }
 0x5b6   : > { %2107 = vmatprep.subr.bf16.mxu1 %v2195_v54 }
 0x5b8   : > { %2105 = vmatmul.mubr.f32.vlgmr.msra.gmra.mrb[48].mxu1 %v1409_v48 }
 0x5b9   : > { %2108 = vmatpush3.bf16.msra.mxu1 %v2179_v49  ;;  %2111 = vmatprep.mubr.msk.bf16.mxu1 %vm2194_vm2, %v2195_v54 }
 0x5ba   : > { %2109 = vmatprep.subr.bf16.mxu1 %v2195_v54 }
 0x5bd   : > { %2110 = vmatpush3.bf16.msra.mxu1 %v2180_v50 }
 0x5be   : > { %2115 = vmatprep.subr.bf16.mxu1 %v2195_v54 }
 0x68b   : > { %v1476_v51 = vpop.f32.mrb[48].mxu1 }
 0x68c   : > { %v1480_v52 = vpack.c.bf16 %v1476_v51, %v1476_v51  ;;  %v2106_v53 = vpop.f32.mrb[49].mxu1 }
 0x68e   : > { %2112 = vmatmul.mubr.msk.bf16.vlgmr.msra.gmra.mrb[52].mxu1 %vm886_vm1, %v1480_v52 }
 0x68f   : > { %2119 = vmatprep.mubr.msk.bf16.mxu1 %vm2194_vm2, %v2195_v54  ;;  %2116 = vmatpush3.bf16.msra.mxu1 %v2181_v25 }
 0x690   : > { %2117 = vmatprep.subr.bf16.mxu1 %v2195_v54 }
 0x693   : > { %2118 = vmatpush3.bf16.msra.mxu1 %v2182_v26 }
 0x694   : > { %2123 = vmatprep.subr.bf16.mxu1 %v2195_v54 }
 0x761   : > { %v1541_v28 = vpop.f32.mrb[52].mxu1 }
 0x762   : > { %v1542_v29 = vadd.f32 %v1800_v27, %v1541_v28  ;;  %v2113_v55 = vpop.f32.mrb[53].mxu1 }
 0x763   : > { %v1544_v30 = vpop.f32.mrb[54].mxu1 }
 0x764   : > { %v1547_v56 = vmax.f32 %v1542_v29, 0.0  ;;  %v2114_v31 = vpop.f32.mrb[55].mxu1 }
 0x766   : > { %v1548_v57 = vpack.c.bf16 %v1547_v56, %v1547_v56 }
 0x768   : > { %2120 = vmatmul.mubr.msk.bf16.vlgmr.msra.gmra.mrb[56].mxu1 %vm886_vm1, %v1548_v57 }
 0x769   : > { %2127 = vmatprep.mubr.msk.bf16.mxu1 %vm2194_vm2, %v2195_v54  ;;  %2124 = vmatpush3.bf16.msra.mxu1 %v2183_v58 }
 0x76a   : > { %2125 = vmatprep.subr.bf16.mxu1 %v2195_v54  ;;  %v1808_v54 = vld [vmem:[%s2485_s14] ss:$0 sm:$0xff] }
 0x76d   : > { %2126 = vmatpush3.bf16.msra.mxu1 %v2184_v60 }
 0x83b   : > { %v1609_v62 = vpop.f32.mrb[56].mxu1 }
 0x83c   : > { %v1610_v59 = vadd.f32 %v1804_v61, %v1609_v62  ;;  %v2121_v63 = vpop.f32.mrb[57].mxu1 }
 0x83d   : > { %v1612_v1 = vpop.f32.mrb[58].mxu1 }
 0x83e   : > { %v1615_v2 = vmax.f32 %v1610_v59, 0.0  ;;  %v2122_v3 = vpop.f32.mrb[59].mxu1 }
 0x840   : > { %v1616_v4 = vpack.c.bf16 %v1615_v2, %v1615_v2 }
 0x842   : > { %2128 = vmatmul.mubr.msk.bf16.vlgmr.msra.gmra.mrb[60].mxu1 %vm886_vm1, %v1616_v4 }
 0x915   : > { %v1677_v5 = vpop.f32.mrb[60].mxu1 }
 0x916   : > { %v1678_v6 = vadd.f32 %v1808_v54, %v1677_v5  ;;  %v2129_v7 = vpop.f32.mrb[61].mxu1 }
 0x917   : > { %v1680_v8 = vpop.f32.mrb[62].mxu1 }
 0x918   : > { %1684 = vst.msk [vmem:[%s514_s29] sm:$0xff] %vm1683_vm3, %v1678_v6  ;;  %v2130_v9 = vpop.f32.mrb[63].mxu1 }
 0x919 PF: > { %s25_s18 = sadd.s32 1, %s2191_s18  }
 0x91a   : > { %p22_p5 = scmp.ge.s32.totalorder %s25_s18, 4  }
 0x91c   :  { %24 = sbr.rel (!%p22_p5) target bundleno = 1 (0x1), region = 113 }

</bundles_post_ra>
